<compile_context>
chip_gen: v6e
topology: v6e:2x2x1
jax: 0.10.0
libtpu: 0.0.40
codegen_flags: <defaults>
</compile_context>

<pallas_src>
import jax
import jax.numpy as jnp
from jax import lax
from jax.experimental import pallas as pl
from jax.experimental.pallas import tpu as pltpu


def _channel_matmul(w, x):
    """(M, K) @ (K, L) -> (M, L), f32 result.

    Tiny K (<= 8): exact f32 VPU broadcast-FMA (the MXU would be <1% utilized
    there).  Otherwise: bf16 x bf16 MXU matmul with f32 accumulation — native
    MXU rate on v5e/v6e/v7x (f32 x f32 is decomposed into multiple passes).
    """
    k = w.shape[1]
    if k <= 8:
        acc = w[:, 0:1] * x[0:1, :]
        for c in range(1, k):
            acc = acc + w[:, c:c + 1] * x[c:c + 1, :]
        return acc
    # TODO(synk): for best MXU cadence also pad the channel dims (P/Cin/Cout)
    # to the MXU width (128 on v5e, 256 on v6e/v7x) in prepare_params.
    return jnp.dot(w.astype(jnp.bfloat16), x.astype(jnp.bfloat16),
                   preferred_element_type=jnp.float32)


def _make_resblock1_kernel(tile_rows, W):
    TH = tile_rows
    TILE = TH * W
    EXT = (TH + 2) * W   # tile rows plus one halo row above and below

    def kernel(x_ref, up_ref, dn_ref, col_ref, w1_ref, b1_ref, w2_ref, b2_ref,
               w3_ref, b3_ref, o_ref):
        t = pl.program_id(1)
        nt = pl.num_programs(1)

        x = x_ref[0].astype(jnp.float32)          # (Cin, TILE)  main tile
        xu = up_ref[0, 0].astype(jnp.float32)     # (Cin, W)     row above tile
        xd = dn_ref[0, 0].astype(jnp.float32)     # (Cin, W)     row below tile
        x_ext = jnp.concatenate([xu, x, xd], axis=1)   # (Cin, EXT)

        # ---- conv1 (1x1, BN1 scale pre-folded) + bias + relu -> (P, EXT) ----
        h1 = jnp.maximum(_channel_matmul(w1_ref[...], x_ext) + b1_ref[...], 0.0)

        # conv2 zero-pads *h1* at the image border (not x), so kill the halo
        # rows of h1 when this tile touches the top / bottom of the image.
        idx = lax.broadcasted_iota(jnp.int32, (1, EXT), 1)
        kill = jnp.logical_or(
            jnp.logical_and(idx < W, t == 0),                  # halo row above
            jnp.logical_and(idx >= (TH + 1) * W, t == nt - 1))  # halo row below
        h1 = jnp.where(kill, 0.0, h1)

        # ---- conv2: 3x3 depthwise, stride 1, pad 1 (BN2 scale folded) -------
        # Horizontal neighbours are lane rolls + column masks (computed once,
        # no in-kernel integer div/mod: column ids come in as a tiny input).
        col = col_ref[...]                         # (1, EXT) int32
        has_l = col >= 1
        has_r = col <= W - 2
        left = jnp.where(has_l, pltpu.roll(h1, shift=1, axis=1), 0.0)        # h1[., x-1]
        right = jnp.where(has_r, pltpu.roll(h1, shift=EXT - 1, axis=1), 0.0)  # h1[., x+1]

        w2 = w2_ref[...]                           # (P, 9), k = 3*dy + dx

        def row_taps(dy):                          # (P, EXT)
            wl = w2[:, 3 * dy + 0:3 * dy + 1]
            wc = w2[:, 3 * dy + 1:3 * dy + 2]
            wr = w2[:, 3 * dy + 2:3 * dy + 3]
            return left * wl + h1 * wc + right * wr

        # Interleaved vertical accumulation: each row-tap dies immediately.
        acc = row_taps(1)
        acc = acc + pltpu.roll(row_taps(0), shift=W, axis=1)          # row y-1
        acc = acc + pltpu.roll(row_taps(2), shift=EXT - W, axis=1)    # row y+1
        h2 = jnp.maximum(acc + b2_ref[...], 0.0)

        # Drop the two halo rows; keep the interior TILE lanes.
        h2 = h2[:, W:W + TILE]                     # (P, TILE)

        # ---- conv3 (1x1, BN3 scale pre-folded) + bias + residual add --------
        h3 = _channel_matmul(w3_ref[...], h2) + b3_ref[...]
        o_ref[0] = (h3 + x).astype(o_ref.dtype)

    return kernel


def fold_batchnorm(gamma, beta, mean, var, eps=1e-5):
    scale = gamma / jnp.sqrt(var + eps)
    return scale, beta - mean * scale


def prepare_params(w1, w2, w3, bn1, bn2, bn3, eps=1e-5):
    """Fold inference BatchNorm into the conv weights (zero runtime cost).

    w1: (P, Cin, 1, 1), w2: (P, 1, 3, 3) depthwise, w3: (Cout, P, 1, 1)
    bn*: (gamma, beta, running_mean, running_var)
    """
    P, Cin = w1.shape[0], w1.shape[1]
    Cout = w3.shape[0]
    s1, b1 = fold_batchnorm(*bn1, eps=eps)
    s2, b2 = fold_batchnorm(*bn2, eps=eps)
    s3, b3 = fold_batchnorm(*bn3, eps=eps)
    f32 = jnp.float32
    w1f = (w1.reshape(P, Cin) * s1[:, None]).astype(f32)       # (P, Cin)
    w2f = (w2.reshape(P, 9) * s2[:, None]).astype(f32)         # (P, 9)
    w3f = (w3.reshape(Cout, P) * s3[:, None]).astype(f32)      # (Cout, P)
    return (w1f, b1.reshape(P, 1).astype(f32),
            w2f, b2.reshape(P, 1).astype(f32),
            w3f, b3.reshape(Cout, 1).astype(f32))


def _pick_tile_rows(H, W, max_lanes=2048):
    """Rows of H per spatial tile.

    Constraints: tile row count must divide H, and the tile must either span
    the whole flattened H*W axis (block == full dim) or be a lane-dense
    multiple of 128 lanes (legal BlockSpec + unmasked vst).  Prefer >= 2 tiles
    per image so the pipeline has steps to overlap and megacore has work.
    """
    HW = H * W
    if HW <= max_lanes and HW % 128 != 0:
        return H                                  # tiny / awkward image: one full block
    cands = [d for d in range(1, H + 1)
             if H % d == 0 and (d * W) % 128 == 0 and d * W <= max_lanes]
    multi = [d for d in cands if d < H]
    if multi:
        return max(multi)
    if cands:
        return max(cands)
    # TODO(synk): for shapes with no lane-dense row tiling (e.g. 14x14), pad W
    # (or HW) to a multiple of 128 in the wrapper instead of falling back to a
    # single whole-image block.
    return H


def _vmem_limit_bytes(est):
    cap = 48 * 1024 * 1024                  # safe on every generation (v7x: 64 MiB)
    try:
        phys = getattr(pltpu.get_tpu_info(), "vmem_capacity_bytes", None)
        if phys:                            # ~52 MiB on v7x, ~110+ MiB on v5e/v6e
            cap = int(phys) - 12 * 1024 * 1024
    except Exception:
        pass
    return int(min(max(est, 16 * 1024 * 1024), cap))


def resblock1_forward(x_nchw, folded_params, tile_rows=None):
    """ResBlock1.forward, stride=1.  x_nchw: (N, Cin, H, W)."""
    w1f, b1, w2f, b2, w3f, b3 = folded_params
    N, Cin, H, W = x_nchw.shape
    P = w1f.shape[0]
    Cout = w3f.shape[0]
    assert Cout == Cin, "residual `out + x` requires out_planes == in_planes"
    # TODO(synk): stride > 1 not implemented (module default is stride=1; the
    # PyTorch residual add only shape-checks for stride == 1 anyway).
    HW = H * W

    TH = tile_rows if tile_rows is not None else _pick_tile_rows(H, W)
    assert H % TH == 0
    nt = H // TH
    TILE = TH * W
    EXT = (TH + 2) * W

    x_flat = x_nchw.reshape(N, Cin, HW)     # free reshape, no HBM transpose

    # 1-row halos per tile, gathered once by XLA (tiny side arrays):
    #   up[:, t] = global row t*TH - 1, dn[:, t] = global row (t+1)*TH,
    # zeros where the tile touches the image border.
    zrow = jnp.zeros((N, Cin, 1, W), x_nchw.dtype)
    up = jnp.concatenate(
        [zrow, x_nchw[:, :, TH - 1::TH, :][:, :, :nt - 1, :]], axis=2)
    dn = jnp.concatenate([x_nchw[:, :, TH::TH, :], zrow], axis=2)
    up = jnp.transpose(up, (0, 2, 1, 3))    # (N, nt, Cin, W)
    dn = jnp.transpose(dn, (0, 2, 1, 3))    # (N, nt, Cin, W)

    # Column ids of the extended (halo-padded) tile; same for every tile.
    col_ext = jnp.tile(jnp.arange(W, dtype=jnp.int32), TH + 2).reshape(1, EXT)

    def full(shape):
        nd = len(shape)
        return pl.BlockSpec(shape, lambda n, t: (0,) * nd)

    # Per-step VMEM: double-buffered in/out tiles + the (P, EXT) f32
    # intermediates, clamped to a generation-aware cap.
    est = 4 * (2 * Cin * TILE + 2 * Cout * TILE + 4 * Cin * W
               + Cin * EXT + 6 * P * EXT + (P + Cout) * TILE) + (2 << 20)
    vmem_limit = _vmem_limit_bytes(est)

    out_flat = pl.pallas_call(
        _make_resblock1_kernel(TH, W),
        out_shape=jax.ShapeDtypeStruct((N, Cout, HW), x_nchw.dtype),
        grid_spec=pltpu.PrefetchScalarGridSpec(
            num_scalar_prefetch=0,
            grid=(N, nt),
            in_specs=[
                # TODO(synk): sweep pipeline_mode=pl.Buffered(3) here if xprof
                # shows exposed DMA at small tiles.
                pl.BlockSpec((1, Cin, TILE), lambda n, t: (n, 0, t)),
                pl.BlockSpec((1, 1, Cin, W), lambda n, t: (n, t, 0, 0)),
                pl.BlockSpec((1, 1, Cin, W), lambda n, t: (n, t, 0, 0)),
                full((1, EXT)),
                full(w1f.shape), full(b1.shape),
                full(w2f.shape), full(b2.shape),
                full(w3f.shape), full(b3.shape),
            ],
            out_specs=pl.BlockSpec((1, Cout, TILE), lambda n, t: (n, 0, t)),
        ),
        compiler_params=pltpu.CompilerParams(
            dimension_semantics=("parallel", "parallel"),
            vmem_limit_bytes=vmem_limit),
    )(x_flat, up, dn, col_ext, w1f, b1, w2f, b2, w3f, b3)
    # TODO(synk): for bandwidth-bound deployments (esp. v5e, ~820 GB/s HBM)
    # carry x / out in bf16 in HBM and upcast to f32 inside the kernel.
    return out_flat.reshape(N, Cout, H, W)


def _reference(x, w1, w2, w3, bn1, bn2, bn3, eps=1e-5):
    """Pure-JAX/XLA reference in NCHW, BN applied in inference form."""
    dn = ('NCHW', 'OIHW', 'NCHW')
    hp = lax.Precision.HIGHEST
    P = w2.shape[0]

    def bn(z, p):
        gamma, beta, mean, var = p
        s = gamma / jnp.sqrt(var + eps)
        b = beta - mean * s
        return z * s.reshape(1, -1, 1, 1) + b.reshape(1, -1, 1, 1)

    h = jax.nn.relu(bn(lax.conv_general_dilated(
        x, w1, (1, 1), 'VALID', dimension_numbers=dn, precision=hp), bn1))
    h = jax.nn.relu(bn(lax.conv_general_dilated(
        h, w2, (1, 1), ((1, 1), (1, 1)), dimension_numbers=dn,
        feature_group_count=P, precision=hp), bn2))
    h = bn(lax.conv_general_dilated(
        h, w3, (1, 1), 'VALID', dimension_numbers=dn, precision=hp), bn3)
    return h + x


if __name__ == "__main__":
    N, Cin, H, W = 2, 4, 16, 16
    expansion = 2
    P = expansion * Cin          # planes
    Cout = Cin                   # out_planes (== in_planes so `out + x` works)
    eps = 1e-5                   # PyTorch BatchNorm2d default

    key = jax.random.PRNGKey(0)
    keys = jax.random.split(key, 16)

    def make_bn(kg, kb, km, kv, c):
        gamma = jax.random.uniform(kg, (c,), jnp.float32, 0.5, 1.5)
        beta = 0.1 * jax.random.normal(kb, (c,), jnp.float32)
        mean = 0.1 * jax.random.normal(km, (c,), jnp.float32)
        var = jax.random.uniform(kv, (c,), jnp.float32, 0.5, 1.5)
        return (gamma, beta, mean, var)

    # Conv weights in PyTorch layout.
    w1 = 0.3 * jax.random.normal(keys[0], (P, Cin, 1, 1), jnp.float32)
    w2 = 0.3 * jax.random.normal(keys[1], (P, 1, 3, 3), jnp.float32)
    w3 = 0.3 * jax.random.normal(keys[2], (Cout, P, 1, 1), jnp.float32)
    bn1 = make_bn(keys[3], keys[4], keys[5], keys[6], P)
    bn2 = make_bn(keys[7], keys[8], keys[9], keys[10], P)
    bn3 = make_bn(keys[11], keys[12], keys[13], keys[14], Cout)

    x = jax.random.normal(keys[15], (N, Cin, H, W), jnp.float32)

    folded = prepare_params(w1, w2, w3, bn1, bn2, bn3, eps=eps)
    # Default tiling for 16x16 is 8 rows/tile -> grid (N=2, tiles=2), which
    # exercises the interior-halo path as well as the image-border path.
    out = jax.block_until_ready(resblock1_forward(x, folded))
    ref = jax.block_until_ready(_reference(x, w1, w2, w3, bn1, bn2, bn3, eps=eps))

    assert out.shape == (N, Cout, H, W)
    max_err = float(jnp.max(jnp.abs(out - ref)))
    assert jnp.allclose(out, ref, rtol=1e-4, atol=1e-4), max_err
    print("KERNEL_OK")
</pallas_src>

<mosaic_0001>
module attributes {stable_mosaic.version = 11 : i64} {
  func.func @kernel(%arg0: i32, %arg1: i32, %arg2: memref<1x4x128xf32, #tpu.memory_space<vmem>>, %arg3: memref<1x1x4x16xf32, #tpu.memory_space<vmem>>, %arg4: memref<1x1x4x16xf32, #tpu.memory_space<vmem>>, %arg5: memref<1x160xi32, #tpu.memory_space<vmem>>, %arg6: memref<8x4xf32, #tpu.memory_space<vmem>>, %arg7: memref<8x1xf32, #tpu.memory_space<vmem>>, %arg8: memref<8x9xf32, #tpu.memory_space<vmem>>, %arg9: memref<8x1xf32, #tpu.memory_space<vmem>>, %arg10: memref<4x8xf32, #tpu.memory_space<vmem>>, %arg11: memref<4x1xf32, #tpu.memory_space<vmem>>, %arg12: memref<1x4x128xf32, #tpu.memory_space<vmem>>) attributes {dimension_semantics = [#tpu.dimension_semantics<parallel>, #tpu.dimension_semantics<parallel>], iteration_bounds = array<i64: 2, 2>, scalar_prefetch = 0 : i64, scratch_operands = 0 : i64, tpu.core_type = #tpu.core_type<tc>, window_params = [{transform_indices = @transform_0, window_bounds = array<i64: 1, 4, 128>}, {transform_indices = @transform_1, window_bounds = array<i64: 1, 1, 4, 16>}, {transform_indices = @transform_2, window_bounds = array<i64: 1, 1, 4, 16>}, {pipeline_mode = #tpu.pipeline_mode<synchronous>, transform_indices = @transform_3, window_bounds = array<i64: 1, 160>}, {pipeline_mode = #tpu.pipeline_mode<synchronous>, transform_indices = @transform_4, window_bounds = array<i64: 8, 4>}, {pipeline_mode = #tpu.pipeline_mode<synchronous>, transform_indices = @transform_5, window_bounds = array<i64: 8, 1>}, {pipeline_mode = #tpu.pipeline_mode<synchronous>, transform_indices = @transform_6, window_bounds = array<i64: 8, 9>}, {pipeline_mode = #tpu.pipeline_mode<synchronous>, transform_indices = @transform_7, window_bounds = array<i64: 8, 1>}, {pipeline_mode = #tpu.pipeline_mode<synchronous>, transform_indices = @transform_8, window_bounds = array<i64: 4, 8>}, {pipeline_mode = #tpu.pipeline_mode<synchronous>, transform_indices = @transform_9, window_bounds = array<i64: 4, 1>}, {transform_indices = @transform_10, window_bounds = array<i64: 1, 4, 128>}]} {
    %c0 = arith.constant 0 : index
    %c0_0 = arith.constant 0 : index
    %c0_1 = arith.constant 0 : index
    %0 = vector.load %arg2[%c0, %c0_0, %c0_1] : memref<1x4x128xf32, #tpu.memory_space<vmem>>, vector<1x4x128xf32>
    %1 = vector.shape_cast %0 : vector<1x4x128xf32> to vector<4x128xf32>
    %c0_2 = arith.constant 0 : index
    %c0_3 = arith.constant 0 : index
    %c0_4 = arith.constant 0 : index
    %c0_5 = arith.constant 0 : index
    %2 = vector.load %arg3[%c0_2, %c0_3, %c0_4, %c0_5] : memref<1x1x4x16xf32, #tpu.memory_space<vmem>>, vector<1x1x4x16xf32>
    %3 = vector.shape_cast %2 : vector<1x1x4x16xf32> to vector<4x16xf32>
    %c0_6 = arith.constant 0 : index
    %c0_7 = arith.constant 0 : index
    %c0_8 = arith.constant 0 : index
    %c0_9 = arith.constant 0 : index
    %4 = vector.load %arg4[%c0_6, %c0_7, %c0_8, %c0_9] : memref<1x1x4x16xf32, #tpu.memory_space<vmem>>, vector<1x1x4x16xf32>
    %5 = vector.shape_cast %4 : vector<1x1x4x16xf32> to vector<4x16xf32>
    %6 = tpu.concatenate %3, %1, %5 in 1 : vector<4x16xf32>, vector<4x128xf32>, vector<4x16xf32> -> vector<4x160xf32>
    %c0_10 = arith.constant 0 : index
    %c0_11 = arith.constant 0 : index
    %7 = vector.load %arg6[%c0_10, %c0_11] : memref<8x4xf32, #tpu.memory_space<vmem>>, vector<8x4xf32>
    %8 = vector.extract_strided_slice %7 {offsets = [0, 0], sizes = [8, 1], strides = [1, 1]} : vector<8x4xf32> to vector<8x1xf32>
    %9 = vector.extract_strided_slice %6 {offsets = [0, 0], sizes = [1, 160], strides = [1, 1]} : vector<4x160xf32> to vector<1x160xf32>
    %10 = vector.broadcast %8 : vector<8x1xf32> to vector<8x160xf32>
    %11 = vector.broadcast %9 : vector<1x160xf32> to vector<8x160xf32>
    %12 = arith.mulf %10, %11 : vector<8x160xf32>
    %13 = vector.extract_strided_slice %7 {offsets = [0, 1], sizes = [8, 1], strides = [1, 1]} : vector<8x4xf32> to vector<8x1xf32>
    %14 = vector.extract_strided_slice %6 {offsets = [1, 0], sizes = [1, 160], strides = [1, 1]} : vector<4x160xf32> to vector<1x160xf32>
    %15 = vector.broadcast %13 : vector<8x1xf32> to vector<8x160xf32>
    %16 = vector.broadcast %14 : vector<1x160xf32> to vector<8x160xf32>
    %17 = arith.mulf %15, %16 : vector<8x160xf32>
    %18 = arith.addf %12, %17 : vector<8x160xf32>
    %19 = vector.extract_strided_slice %7 {offsets = [0, 2], sizes = [8, 1], strides = [1, 1]} : vector<8x4xf32> to vector<8x1xf32>
    %20 = vector.extract_strided_slice %6 {offsets = [2, 0], sizes = [1, 160], strides = [1, 1]} : vector<4x160xf32> to vector<1x160xf32>
    %21 = vector.broadcast %19 : vector<8x1xf32> to vector<8x160xf32>
    %22 = vector.broadcast %20 : vector<1x160xf32> to vector<8x160xf32>
    %23 = arith.mulf %21, %22 : vector<8x160xf32>
    %24 = arith.addf %18, %23 : vector<8x160xf32>
    %25 = vector.extract_strided_slice %7 {offsets = [0, 3], sizes = [8, 1], strides = [1, 1]} : vector<8x4xf32> to vector<8x1xf32>
    %26 = vector.extract_strided_slice %6 {offsets = [3, 0], sizes = [1, 160], strides = [1, 1]} : vector<4x160xf32> to vector<1x160xf32>
    %27 = vector.broadcast %25 : vector<8x1xf32> to vector<8x160xf32>
    %28 = vector.broadcast %26 : vector<1x160xf32> to vector<8x160xf32>
    %29 = arith.mulf %27, %28 : vector<8x160xf32>
    %30 = arith.addf %24, %29 : vector<8x160xf32>
    %c0_12 = arith.constant 0 : index
    %c0_13 = arith.constant 0 : index
    %31 = vector.load %arg7[%c0_12, %c0_13] : memref<8x1xf32, #tpu.memory_space<vmem>>, vector<8x1xf32>
    %32 = vector.broadcast %31 : vector<8x1xf32> to vector<8x160xf32>
    %33 = arith.addf %30, %32 : vector<8x160xf32>
    %cst = arith.constant 0.000000e+00 : f32
    %34 = vector.broadcast %cst : f32 to vector<8x160xf32>
    %35 = arith.maximumf %33, %34 : vector<8x160xf32>
    %36 = tpu.iota {dimensions = array<i32: 1>} : vector<1x160xi32>
    %c16_i32 = arith.constant 16 : i32
    %37 = vector.broadcast %c16_i32 : i32 to vector<1x160xi32>
    %38 = arith.cmpi slt, %36, %37 : vector<1x160xi32>
    %c0_i32 = arith.constant 0 : i32
    %39 = arith.cmpi eq, %arg1, %c0_i32 : i32
    %40 = vector.broadcast %39 : i1 to vector<1x160xi1>
    %41 = arith.andi %38, %40 : vector<1x160xi1>
    %c144_i32 = arith.constant 144 : i32
    %42 = vector.broadcast %c144_i32 : i32 to vector<1x160xi32>
    %43 = arith.cmpi sge, %36, %42 : vector<1x160xi32>
    %c1_i32 = arith.constant 1 : i32
    %44 = arith.cmpi eq, %arg1, %c1_i32 : i32
    %45 = vector.broadcast %44 : i1 to vector<1x160xi1>
    %46 = arith.andi %43, %45 : vector<1x160xi1>
    %47 = arith.ori %41, %46 : vector<1x160xi1>
    %cst_14 = arith.constant 0.000000e+00 : f32
    %48 = vector.shape_cast %47 : vector<1x160xi1> to vector<1x160xi1>
    %49 = vector.broadcast %48 : vector<1x160xi1> to vector<8x160xi1>
    %50 = vector.broadcast %cst_14 : f32 to vector<8x160xf32>
    %51 = arith.select %49, %50, %35 : vector<8x160xi1>, vector<8x160xf32>
    %c0_15 = arith.constant 0 : index
    %c0_16 = arith.constant 0 : index
    %52 = vector.load %arg5[%c0_15, %c0_16] : memref<1x160xi32, #tpu.memory_space<vmem>>, vector<1x160xi32>
    %c1_i32_17 = arith.constant 1 : i32
    %53 = vector.broadcast %c1_i32_17 : i32 to vector<1x160xi32>
    %54 = arith.cmpi sge, %52, %53 : vector<1x160xi32>
    %c14_i32 = arith.constant 14 : i32
    %55 = vector.broadcast %c14_i32 : i32 to vector<1x160xi32>
    %56 = arith.cmpi sle, %52, %55 : vector<1x160xi32>
    %c1_i32_18 = arith.constant 1 : i32
    %57 = tpu.dynamic_rotate %51 by %c1_i32_18 dim 1 : vector<8x160xf32>, i32 -> vector<8x160xf32>
    %cst_19 = arith.constant 0.000000e+00 : f32
    %58 = vector.shape_cast %54 : vector<1x160xi1> to vector<1x160xi1>
    %59 = vector.broadcast %58 : vector<1x160xi1> to vector<8x160xi1>
    %60 = vector.broadcast %cst_19 : f32 to vector<8x160xf32>
    %61 = arith.select %59, %57, %60 : vector<8x160xi1>, vector<8x160xf32>
    %c159_i32 = arith.constant 159 : i32
    %62 = tpu.dynamic_rotate %51 by %c159_i32 dim 1 : vector<8x160xf32>, i32 -> vector<8x160xf32>
    %cst_20 = arith.constant 0.000000e+00 : f32
    %63 = vector.shape_cast %56 : vector<1x160xi1> to vector<1x160xi1>
    %64 = vector.broadcast %63 : vector<1x160xi1> to vector<8x160xi1>
    %65 = vector.broadcast %cst_20 : f32 to vector<8x160xf32>
    %66 = arith.select %64, %62, %65 : vector<8x160xi1>, vector<8x160xf32>
    %c0_21 = arith.constant 0 : index
    %c0_22 = arith.constant 0 : index
    %67 = vector.load %arg8[%c0_21, %c0_22] : memref<8x9xf32, #tpu.memory_space<vmem>>, vector<8x9xf32>
    %68 = vector.extract_strided_slice %67 {offsets = [0, 3], sizes = [8, 1], strides = [1, 1]} : vector<8x9xf32> to vector<8x1xf32>
    %69 = vector.extract_strided_slice %67 {offsets = [0, 4], sizes = [8, 1], strides = [1, 1]} : vector<8x9xf32> to vector<8x1xf32>
    %70 = vector.extract_strided_slice %67 {offsets = [0, 5], sizes = [8, 1], strides = [1, 1]} : vector<8x9xf32> to vector<8x1xf32>
    %71 = vector.broadcast %68 : vector<8x1xf32> to vector<8x160xf32>
    %72 = arith.mulf %61, %71 : vector<8x160xf32>
    %73 = vector.broadcast %69 : vector<8x1xf32> to vector<8x160xf32>
    %74 = arith.mulf %51, %73 : vector<8x160xf32>
    %75 = arith.addf %72, %74 : vector<8x160xf32>
    %76 = vector.broadcast %70 : vector<8x1xf32> to vector<8x160xf32>
    %77 = arith.mulf %66, %76 : vector<8x160xf32>
    %78 = arith.addf %75, %77 : vector<8x160xf32>
    %79 = vector.extract_strided_slice %67 {offsets = [0, 0], sizes = [8, 1], strides = [1, 1]} : vector<8x9xf32> to vector<8x1xf32>
    %80 = vector.extract_strided_slice %67 {offsets = [0, 1], sizes = [8, 1], strides = [1, 1]} : vector<8x9xf32> to vector<8x1xf32>
    %81 = vector.extract_strided_slice %67 {offsets = [0, 2], sizes = [8, 1], strides = [1, 1]} : vector<8x9xf32> to vector<8x1xf32>
    %82 = vector.broadcast %79 : vector<8x1xf32> to vector<8x160xf32>
    %83 = arith.mulf %61, %82 : vector<8x160xf32>
    %84 = vector.broadcast %80 : vector<8x1xf32> to vector<8x160xf32>
    %85 = arith.mulf %51, %84 : vector<8x160xf32>
    %86 = arith.addf %83, %85 : vector<8x160xf32>
    %87 = vector.broadcast %81 : vector<8x1xf32> to vector<8x160xf32>
    %88 = arith.mulf %66, %87 : vector<8x160xf32>
    %89 = arith.addf %86, %88 : vector<8x160xf32>
    %c16_i32_23 = arith.constant 16 : i32
    %90 = tpu.dynamic_rotate %89 by %c16_i32_23 dim 1 : vector<8x160xf32>, i32 -> vector<8x160xf32>
    %91 = arith.addf %78, %90 : vector<8x160xf32>
    %92 = vector.extract_strided_slice %67 {offsets = [0, 6], sizes = [8, 1], strides = [1, 1]} : vector<8x9xf32> to vector<8x1xf32>
    %93 = vector.extract_strided_slice %67 {offsets = [0, 7], sizes = [8, 1], strides = [1, 1]} : vector<8x9xf32> to vector<8x1xf32>
    %94 = vector.extract_strided_slice %67 {offsets = [0, 8], sizes = [8, 1], strides = [1, 1]} : vector<8x9xf32> to vector<8x1xf32>
    %95 = vector.broadcast %92 : vector<8x1xf32> to vector<8x160xf32>
    %96 = arith.mulf %61, %95 : vector<8x160xf32>
    %97 = vector.broadcast %93 : vector<8x1xf32> to vector<8x160xf32>
    %98 = arith.mulf %51, %97 : vector<8x160xf32>
    %99 = arith.addf %96, %98 : vector<8x160xf32>
    %100 = vector.broadcast %94 : vector<8x1xf32> to vector<8x160xf32>
    %101 = arith.mulf %66, %100 : vector<8x160xf32>
    %102 = arith.addf %99, %101 : vector<8x160xf32>
    %c144_i32_24 = arith.constant 144 : i32
    %103 = tpu.dynamic_rotate %102 by %c144_i32_24 dim 1 : vector<8x160xf32>, i32 -> vector<8x160xf32>
    %104 = arith.addf %91, %103 : vector<8x160xf32>
    %c0_25 = arith.constant 0 : index
    %c0_26 = arith.constant 0 : index
    %105 = vector.load %arg9[%c0_25, %c0_26] : memref<8x1xf32, #tpu.memory_space<vmem>>, vector<8x1xf32>
    %106 = vector.broadcast %105 : vector<8x1xf32> to vector<8x160xf32>
    %107 = arith.addf %104, %106 : vector<8x160xf32>
    %cst_27 = arith.constant 0.000000e+00 : f32
    %108 = vector.broadcast %cst_27 : f32 to vector<8x160xf32>
    %109 = arith.maximumf %107, %108 : vector<8x160xf32>
    %110 = vector.extract_strided_slice %109 {offsets = [0, 16], sizes = [8, 128], strides = [1, 1]} : vector<8x160xf32> to vector<8x128xf32>
    %c0_28 = arith.constant 0 : index
    %c0_29 = arith.constant 0 : index
    %111 = vector.load %arg10[%c0_28, %c0_29] : memref<4x8xf32, #tpu.memory_space<vmem>>, vector<4x8xf32>
    %112 = vector.extract_strided_slice %111 {offsets = [0, 0], sizes = [4, 1], strides = [1, 1]} : vector<4x8xf32> to vector<4x1xf32>
    %113 = vector.extract_strided_slice %110 {offsets = [0, 0], sizes = [1, 128], strides = [1, 1]} : vector<8x128xf32> to vector<1x128xf32>
    %114 = vector.broadcast %112 : vector<4x1xf32> to vector<4x128xf32>
    %115 = vector.broadcast %113 : vector<1x128xf32> to vector<4x128xf32>
    %116 = arith.mulf %114, %115 : vector<4x128xf32>
    %117 = vector.extract_strided_slice %111 {offsets = [0, 1], sizes = [4, 1], strides = [1, 1]} : vector<4x8xf32> to vector<4x1xf32>
    %118 = vector.extract_strided_slice %110 {offsets = [1, 0], sizes = [1, 128], strides = [1, 1]} : vector<8x128xf32> to vector<1x128xf32>
    %119 = vector.broadcast %117 : vector<4x1xf32> to vector<4x128xf32>
    %120 = vector.broadcast %118 : vector<1x128xf32> to vector<4x128xf32>
    %121 = arith.mulf %119, %120 : vector<4x128xf32>
    %122 = arith.addf %116, %121 : vector<4x128xf32>
    %123 = vector.extract_strided_slice %111 {offsets = [0, 2], sizes = [4, 1], strides = [1, 1]} : vector<4x8xf32> to vector<4x1xf32>
    %124 = vector.extract_strided_slice %110 {offsets = [2, 0], sizes = [1, 128], strides = [1, 1]} : vector<8x128xf32> to vector<1x128xf32>
    %125 = vector.broadcast %123 : vector<4x1xf32> to vector<4x128xf32>
    %126 = vector.broadcast %124 : vector<1x128xf32> to vector<4x128xf32>
    %127 = arith.mulf %125, %126 : vector<4x128xf32>
    %128 = arith.addf %122, %127 : vector<4x128xf32>
    %129 = vector.extract_strided_slice %111 {offsets = [0, 3], sizes = [4, 1], strides = [1, 1]} : vector<4x8xf32> to vector<4x1xf32>
    %130 = vector.extract_strided_slice %110 {offsets = [3, 0], sizes = [1, 128], strides = [1, 1]} : vector<8x128xf32> to vector<1x128xf32>
    %131 = vector.broadcast %129 : vector<4x1xf32> to vector<4x128xf32>
    %132 = vector.broadcast %130 : vector<1x128xf32> to vector<4x128xf32>
    %133 = arith.mulf %131, %132 : vector<4x128xf32>
    %134 = arith.addf %128, %133 : vector<4x128xf32>
    %135 = vector.extract_strided_slice %111 {offsets = [0, 4], sizes = [4, 1], strides = [1, 1]} : vector<4x8xf32> to vector<4x1xf32>
    %136 = vector.extract_strided_slice %110 {offsets = [4, 0], sizes = [1, 128], strides = [1, 1]} : vector<8x128xf32> to vector<1x128xf32>
    %137 = vector.broadcast %135 : vector<4x1xf32> to vector<4x128xf32>
    %138 = vector.broadcast %136 : vector<1x128xf32> to vector<4x128xf32>
    %139 = arith.mulf %137, %138 : vector<4x128xf32>
    %140 = arith.addf %134, %139 : vector<4x128xf32>
    %141 = vector.extract_strided_slice %111 {offsets = [0, 5], sizes = [4, 1], strides = [1, 1]} : vector<4x8xf32> to vector<4x1xf32>
    %142 = vector.extract_strided_slice %110 {offsets = [5, 0], sizes = [1, 128], strides = [1, 1]} : vector<8x128xf32> to vector<1x128xf32>
    %143 = vector.broadcast %141 : vector<4x1xf32> to vector<4x128xf32>
    %144 = vector.broadcast %142 : vector<1x128xf32> to vector<4x128xf32>
    %145 = arith.mulf %143, %144 : vector<4x128xf32>
    %146 = arith.addf %140, %145 : vector<4x128xf32>
    %147 = vector.extract_strided_slice %111 {offsets = [0, 6], sizes = [4, 1], strides = [1, 1]} : vector<4x8xf32> to vector<4x1xf32>
    %148 = vector.extract_strided_slice %110 {offsets = [6, 0], sizes = [1, 128], strides = [1, 1]} : vector<8x128xf32> to vector<1x128xf32>
    %149 = vector.broadcast %147 : vector<4x1xf32> to vector<4x128xf32>
    %150 = vector.broadcast %148 : vector<1x128xf32> to vector<4x128xf32>
    %151 = arith.mulf %149, %150 : vector<4x128xf32>
    %152 = arith.addf %146, %151 : vector<4x128xf32>
    %153 = vector.extract_strided_slice %111 {offsets = [0, 7], sizes = [4, 1], strides = [1, 1]} : vector<4x8xf32> to vector<4x1xf32>
    %154 = vector.extract_strided_slice %110 {offsets = [7, 0], sizes = [1, 128], strides = [1, 1]} : vector<8x128xf32> to vector<1x128xf32>
    %155 = vector.broadcast %153 : vector<4x1xf32> to vector<4x128xf32>
    %156 = vector.broadcast %154 : vector<1x128xf32> to vector<4x128xf32>
    %157 = arith.mulf %155, %156 : vector<4x128xf32>
    %158 = arith.addf %152, %157 : vector<4x128xf32>
    %c0_30 = arith.constant 0 : index
    %c0_31 = arith.constant 0 : index
    %159 = vector.load %arg11[%c0_30, %c0_31] : memref<4x1xf32, #tpu.memory_space<vmem>>, vector<4x1xf32>
    %160 = vector.broadcast %159 : vector<4x1xf32> to vector<4x128xf32>
    %161 = arith.addf %158, %160 : vector<4x128xf32>
    %162 = arith.addf %161, %1 : vector<4x128xf32>
    %c0_32 = arith.constant 0 : index
    %c0_33 = arith.constant 0 : index
    %c0_34 = arith.constant 0 : index
    %163 = vector.load %arg12[%c0_32, %c0_33, %c0_34] : memref<1x4x128xf32, #tpu.memory_space<vmem>>, vector<1x4x128xf32>
    %164 = vector.shape_cast %163 : vector<1x4x128xf32> to vector<4x128xf32>
    %165 = vector.shape_cast %162 : vector<4x128xf32> to vector<1x4x128xf32>
    tpu.vector_store %arg12[%c0_32, %c0_33, %c0_34], %165 {strides = array<i32>} : memref<1x4x128xf32, #tpu.memory_space<vmem>>, vector<1x4x128xf32>,
    return
  }
  func.func @transform_0(%arg0: i32, %arg1: i32) -> (i32, i32, i32) {
    %c0_i32 = arith.constant 0 : i32
    %c0_i32_0 = arith.constant 0 : i32
    return %arg0, %c0_i32, %arg1 : i32, i32, i32
  }
  func.func @transform_1(%arg0: i32, %arg1: i32) -> (i32, i32, i32, i32) {
    %c0_i32 = arith.constant 0 : i32
    %c0_i32_0 = arith.constant 0 : i32
    %c0_i32_1 = arith.constant 0 : i32
    return %arg0, %arg1, %c0_i32, %c0_i32_0 : i32, i32, i32, i32
  }
  func.func @transform_2(%arg0: i32, %arg1: i32) -> (i32, i32, i32, i32) {
    %c0_i32 = arith.constant 0 : i32
    %c0_i32_0 = arith.constant 0 : i32
    %c0_i32_1 = arith.constant 0 : i32
    return %arg0, %arg1, %c0_i32, %c0_i32_0 : i32, i32, i32, i32
  }
  func.func @transform_3(%arg0: i32, %arg1: i32) -> (i32, i32) {
    %c0_i32 = arith.constant 0 : i32
    %c0_i32_0 = arith.constant 0 : i32
    %c0_i32_1 = arith.constant 0 : i32
    return %c0_i32, %c0_i32_0 : i32, i32
  }
  func.func @transform_4(%arg0: i32, %arg1: i32) -> (i32, i32) {
    %c0_i32 = arith.constant 0 : i32
    %c0_i32_0 = arith.constant 0 : i32
    %c0_i32_1 = arith.constant 0 : i32
    return %c0_i32, %c0_i32_0 : i32, i32
  }
  func.func @transform_5(%arg0: i32, %arg1: i32) -> (i32, i32) {
    %c0_i32 = arith.constant 0 : i32
    %c0_i32_0 = arith.constant 0 : i32
    %c0_i32_1 = arith.constant 0 : i32
    return %c0_i32, %c0_i32_0 : i32, i32
  }
  func.func @transform_6(%arg0: i32, %arg1: i32) -> (i32, i32) {
    %c0_i32 = arith.constant 0 : i32
    %c0_i32_0 = arith.constant 0 : i32
    %c0_i32_1 = arith.constant 0 : i32
    return %c0_i32, %c0_i32_0 : i32, i32
  }
  func.func @transform_7(%arg0: i32, %arg1: i32) -> (i32, i32) {
    %c0_i32 = arith.constant 0 : i32
    %c0_i32_0 = arith.constant 0 : i32
    %c0_i32_1 = arith.constant 0 : i32
    return %c0_i32, %c0_i32_0 : i32, i32
  }
  func.func @transform_8(%arg0: i32, %arg1: i32) -> (i32, i32) {
    %c0_i32 = arith.constant 0 : i32
    %c0_i32_0 = arith.constant 0 : i32
    %c0_i32_1 = arith.constant 0 : i32
    return %c0_i32, %c0_i32_0 : i32, i32
  }
  func.func @transform_9(%arg0: i32, %arg1: i32) -> (i32, i32) {
    %c0_i32 = arith.constant 0 : i32
    %c0_i32_0 = arith.constant 0 : i32
    %c0_i32_1 = arith.constant 0 : i32
    return %c0_i32, %c0_i32_0 : i32, i32
  }
  func.func @transform_10(%arg0: i32, %arg1: i32) -> (i32, i32, i32) {
    %c0_i32 = arith.constant 0 : i32
    %c0_i32_0 = arith.constant 0 : i32
    return %arg0, %c0_i32, %arg1 : i32, i32, i32
  }
}

</mosaic_0001>

<bundles_post_ra>
// kernel: tpu_custom_call.1
= control target key start
LH: loop header
LB: loop body
LE: loop exit
PB: predicated region body
PF: predicated region fallthrough
CT: control target
= control target key end

     0   :  { %s1774_s0 = inlined_call_operand.vmem [shape: f32[2,4,256], index: 0, kind: input, shape index: {}]   ;;  %s1775_s1 = inlined_call_operand.vmem [shape: f32[2,2,4,16], index: 1, kind: input, shape index: {}]   ;;  %s1776_s2 = inlined_call_operand.hbm [shape: f32[2,2,4,16], index: 2, kind: input, shape index: {}]   ;;  %s1777_s3 = inlined_call_operand.hbm [shape: s32[1,160], index: 3, kind: input, shape index: {}]   ;;  %s1778_s4 = inlined_call_operand.vmem [shape: f32[8,4], index: 4, kind: input, shape index: {}]   ;;  %s1779_s5 = inlined_call_operand.vmem [shape: f32[8,1], index: 5, kind: input, shape index: {}]   ;;  %s1780_s6 = inlined_call_operand.vmem [shape: f32[8,9], index: 6, kind: input, shape index: {}]   ;;  %s1781_s7 = inlined_call_operand.vmem [shape: f32[8,1], index: 7, kind: input, shape index: {}]   ;;  %s1782_s8 = inlined_call_operand.vmem [shape: f32[4,8], index: 8, kind: input, shape index: {}]   ;;  %s1783_s9 = inlined_call_operand.vmem [shape: f32[4,1], index: 9, kind: input, shape index: {}]   ;;  %s1784_s10 = inlined_call_operand.hbm [shape: f32[2,4,256], index: 10, kind: output, shape index: {}]  }
   0x1   :  { %1792 = sst [smem:[#allocation15_spill]] %s1775_s1 }
   0x2   :  { %1793 = sst [smem:[#allocation16_spill]] %s1777_s3 }
   0x3   :  { %1794 = sst [smem:[#allocation17_spill]] %s1779_s5 }
   0x4   :  { %1795 = sst [smem:[#allocation18_spill]] %s1780_s6 }
   0x5   :  { %1796 = sst [smem:[#allocation19_spill]] %s1781_s7 }
   0x6   :  { %1797 = sst [smem:[#allocation20_spill]] %s1782_s8 }
   0x7   :  { %1798 = sst [smem:[#allocation21_spill]] %s1783_s9 }
   0x8   :  { %1799 = sst [smem:[#allocation22_spill]] %s1784_s10 }
   0x9   :  { %15 = vsyncpa [#allocation3], 0 }
   0xa   :  { %17 = vsyncpa [#allocation3 + $0x1], 0 }
   0xb   :  { %18 = vsyncpa [#allocation6], 0 }
   0xc   :  { %19 = vsyncpa [#allocation4], 0 }
   0xd   :  { %21 = vsyncpa [#allocation4 + $0x1], 0  ;;  %s1417_s13 = smov 0   ;;  %s1419_s14 = smov 0  }
   0xe   :  { %s1421_s15 = smov 0   ;;  %s1423_s16 = smov 0  }
   0xf   :  { %s1425_s17 = smov 0   ;;  %s1427_s18 = smov 0  }
  0x10   :  { %s1429_s19 = smov 0   ;;  %s1431_s20 = smov 0  }
  0x11 LB: > { %1800 = sst [smem:[#allocation11_spill]] %s1315_s13  ;;  %s1042_s21 = sadd.s32 4294967295, %s1343_s20   ;;  %s1343_s20 = sphi %s1431_s20, %s27_s20   ;;  %s1339_s19 = sphi %s1429_s19, %s1832_s19   ;;  %s1335_s18 = sphi %s1427_s18, %s1831_s18   ;;  %s1331_s17 = sphi %s1425_s17, %s1830_s17   ;;  %s1327_s16 = sphi %s1423_s16, %s1829_s16   ;;  %s1323_s15 = sphi %s1421_s15, %s1828_s15   ;;  %s1319_s14 = sphi %s1419_s14, %s1827_s14   ;;  %s1315_s13 = sphi %s1417_s13, %s1826_s13  }
  0x12   : > { %s1043_s22 = sadd.s32 4294967294, %s1343_s20   ;;  %p117_p0 = scmp.ne.s32.totalorder %s1319_s14, %s1315_s13 }
  0x13   : > { %p1461_p1 = scmp.eq.s32.totalorder %s1042_s21, 0  ;;  %p1465_p2 = scmp.eq.s32.totalorder %s1042_s21, 3 }
  0x14   : > { %p296_p3 = scmp.eq.s32.totalorder %s1043_s22, 3  ;;  %p1044_p5 = scmp.ge.s32.totalorder %s1343_s20, 1 }
  0x15   : > { %p1471_p4 = por %p1461_p1, %p117_p0  ;;  %p303_p7 = scmp.lt.s32.totalorder %s1343_s20, 5 }
  0x16   : > { %p1476_p6 = por %p296_p3, %p117_p0  ;;  %s1345_s28 = smov [#allocation5]  }
  0x17   : > { %p1481_p8 = pnand %p1044_p5, %p303_p7  ;;  %s316_s29 = sshll.u32 %s1345_s28, 4  ;;  %s317_s29 = int_to_ptr.vmem [resolvable:$true] %s316_s29 }
  0x18   : > { %s1804_s26 = scalar_select %p1476_p6, 1, 0 }
  0x19   : > { %p1071_p9 = pneg %p1481_p8  ;;  %s36_s30 = sadd.s32 1, %s1335_s18 }
  0x1a   : > { %1805 = sst [smem:[#allocation12_spill]] %s1804_s26  ;;  %s1200_s11 = scalar_lea.vmem %s317_s29, 32 }
  0x1b   : > { %p1072_p10 = pnand %p1071_p9, %p1461_p1  ;;  %p1201_p12 = scmp.ne.s32.totalorder %s317_s29, %s1200_s11 }
  0x1c   : > { %p1208_p3 = scmp.lt.s32.totalorder %s317_s29, %s317_s29  ;;  %p1209_p6 = scmp.lt.s32.totalorder %s1200_s11, %s1200_s11 }
  0x1d   : > { %p1191_p11 = pneg %p1072_p10 }
  0x1e   : > { %p1210_p5 = por %p1209_p6, %p1208_p3 }
  0x1f   : > { %p1203_p13 = pnand %p1201_p12, %p1191_p11 }
  0x21   : > { %p1204_p0 = pneg %p1203_p13 }
  0x23   : > { %p1211_p7 = pnand %p1210_p5, %p1204_p0 }
  0x25   : > { %1214 = shalt.err (!%p1211_p7)
}
  0x26   : > { %s1807_s3 = sld [smem:[#allocation16_spill]]  ;;  %p37_p9 = scmp.ge.s32.totalorder %s36_s30, 2 }
  0x27   : > { %s39_s22 = sadd.s32 1, %s1339_s19  ;;  %s104_s28 = sadd.s32 1, %s1323_s15 }
  0x28   : > { %p111_p6 = scmp.ne.s32.totalorder %s1323_s15, %s1319_s14  ;;  %s1834_s30 = smov (%p37_p9, %s36_s30), 0 }
  0x29   : > { %1808 = sst [smem:[#allocation13_spill]] %s1834_s30  ;;  %s1836_s22 = smov (!%p37_p9, %s39_s22), %s1339_s19 }
  0x2a   : > { %s100_s11 = ssub.s32 %s1335_s18, %s1834_s30  ;;  %p112_p11 = scmp.eq.s32.totalorder %s1343_s20, 0 }
  0x2b   : > { %p41_p12 = scmp.ge.s32.totalorder %s1836_s22, 2  ;;  %p1505_p13 = por %p1465_p2, %p111_p6 }
  0x2c   : > { %1074 = dma.hbm_to_vmem [thread:$0]  (!%p1072_p10), %s1807_s3, 32, %s317_s29, [#allocation6]  }
  0x2d   : > { %s1809_s12 = scalar_select %p1505_p13, 1, 0 }
  0x2e   : > { %p1509_p10 = por %p112_p11, %p111_p6  ;;  %p1084_p0 = scmp.lt.s32.totalorder %s1343_s20, 4 }
  0x2f   : > { %1810 = sst [smem:[#allocation14_spill]] %s1809_s12  ;;  %s1838_s22 = smov (%p41_p12, %s1836_s22), 0 }
  0x30   : > { %s367_s21 = sand.u32 1, %s1323_s15   ;;  %s1048_s3 = sshll.u32 %s1339_s19, 1 }
  0x31   : > { %s99_s30 = ssub.s32 %s1339_s19, %s1838_s22  ;;  %s1047_s13 = sshll.u32 %s367_s21, 2 }
  0x32   : > { %s101_s26 = sor.u32 %s100_s11, %s99_s30  ;;  %s376_s24 = sadd.s32 %s1335_s18, %s1048_s3 }
  0x33   : > { %p102_p3 = scmp.eq.s32.totalorder %s101_s26, 0  ;;  %s371_s10 = scalar_lea.vmem [#allocation2], %s1047_s13 }
  0x34   : > { %s380_s9 = sshll.u32 %s371_s10, 4  ;;  %s1049_s8 = sshll.u32 %s376_s24, 6  ;;  %s381_s9 = int_to_ptr.vmem [resolvable:$true] %s380_s9 }
  0x35   : > { %s1522_s12 = scalar_select %p102_p3, %s1323_s15, %s104_s28  }
  0x36   : > { %s378_s1 = scalar_lea.hbm %s1776_s2, %s1049_s8  ;;  %p1531_p2 = pnand %p1084_p0, %p1509_p10 }
  0x37   : > { %s368_s30 = scalar_lea.sflag [#allocation3], %s367_s21  ;;  %s1228_s3 = scalar_lea.vmem %s381_s9, 64 }
  0x38   : > { %p1217_p5 = pneg %p1531_p2  ;;  %p1229_p7 = scmp.ne.s32.totalorder %s381_s9, %s1228_s3 }
  0x39   : > { %s1346_s10 = smov [#allocation2]  }
  0x3a   : > { %p1231_p9 = pnand %p1229_p7, %p1217_p5  ;;  %s1233_s13 = sshll.u32 %s1346_s10, 4  ;;  %s1234_s13 = int_to_ptr.vmem [resolvable:$false] %s1233_s13 }
  0x3b   : > { %s1235_s26 = scalar_lea.vmem %s1234_s13, 128  ;;  %p1236_p11 = scmp.lt.s32.totalorder %s381_s9, %s1234_s13 }
  0x3c   : > { %p1232_p6 = pneg %p1231_p9  ;;  %p1237_p12 = scmp.lt.s32.totalorder %s1235_s26, %s1228_s3 }
  0x3e   : > { %p1238_p3 = por %p1237_p12, %p1236_p11 }
  0x40   : > { %p1239_p13 = pnand %p1238_p3, %p1232_p6 }
  0x42   : > { %1242 = shalt.err (!%p1239_p13)
}
  0x43   : > { %1078 = dma.hbm_to_vmem [thread:$0]  (!%p1531_p2), %s378_s1, 64, %s381_s9, %s368_s30  }
  0x44   : > { %389 = sbr.rel (%p1481_p8) target bundleno = 1100 (0x44c), region = 60  ;;  %s1542_s6 = sand.u32 (!%p1481_p8), 1, %s1319_s14  }
  0x45   : > { %s1051_s7 = sshll.u32 (!%p1481_p8), %s1542_s6, 2  ;;  %s392_s8 = scalar_lea.sflag (!%p1481_p8), [#allocation3], %s1542_s6 }
  0x46   : > { %s1548_s28 = scalar_lea.vmem (!%p1481_p8), [#allocation2], %s1051_s7 }
  0x49   : > { %1302 = dma.done.wait (%p1471_p4), %s392_s8, 64  }
  0x4a   : > { %1304 = vsyncadd (%p1471_p4), %s392_s8, 4294967232 }
  0x4b   : > { %1306 = dma.done.wait (%p1461_p1), [#allocation6], 32  }
  0x4c   : > { %1308 = vsyncadd (%p1461_p1), [#allocation6], 4294967264  ;;  %p452_p8 = scmp.lt.s32.totalorder %s1331_s17, 1  ;;  %p454_p13 = scmp.lt.s32.totalorder %s1327_s16, 1  ;;  %v1347_v0 = vmov 2   ;;  %v1348_v1 = vmov 0   ;;  %v488_v8 = vlaneseq }
  0x4d   : > { %1168 = vset.pattern.permute.xlu1 %v1347_v0  ;;  %1166 = vset.pattern.permute.xlu0 %v1348_v1  ;;  %v482_v2 = vld [vmem:[%s1778_s4] sm:$0xff]  ;;  %s1349_s30 = smov 16   ;;  %v1350_v4 = vmov 1   ;;  %v1351_v5 = vmov 3   ;;  %s1813_s13 = sld [smem:[#allocation17_spill]]  ;;  %vm479_vm0 = vcmask 130048  }
  0x4e   : > { %s453_s1 = scalar_select %p452_p8, %s1331_s17, 1  ;;  %515 = vperm.xlu1 %1168, %v482_v2   ;;  %485 = vperm.xlu0 %1166, %v482_v2   ;;  %v470_v7 = vld [vmem:[%s1548_s28] sm:$0xf]  ;;  %v1579_v9 = vshrl.u32 %v488_v8, 7  ;;  %v557_v29 = vand.u32 127, %v488_v8  ;;  %v1353_v57 = vmov 6  }
  0x4f   : > { %s455_s5 = scalar_select %p454_p13, %s1327_s16, 1  ;;  %vm586_vm7 = vcmask 1047808   ;;  %v1356_v60 = vmov 7   ;;  %v1357_v61 = vmov 8   ;;  %vm610_vm11 = vcmask 793600  }
  0x50   : > { %s1054_s9 = sshll.u32 %s453_s1, 1  ;;  %s1814_s1 = sld [smem:[#allocation15_spill]]  ;;  %v1585_v13 = vsub.s32 0, %v1579_v9  ;;  %v1588_v14 = vsub.s32 1, %v1579_v9  ;;  %v1591_v15 = vsub.s32 2, %v1579_v9  ;;  %v1599_v19 = vsub.s32 3, %v1579_v9 }
  0x51   : > { %s457_s25 = sadd.s32 %s1054_s9, %s455_s5  ;;  %p561_p1 = scmp.eq.s32.totalorder %s1327_s16, 0  ;;  %vm559_vm1 = vcmp.lt.s32.totalorder %v557_v29, 16  ;;  %v558_v46 = vadd.s32 128, %v557_v29  ;;  %vm632_vm14 = vcmask 1039360  }
  0x52   : > { %s1055_s27 = sshll.u32 %s457_s25, 2  ;;  %1167 = vset.pattern.permute.xlu0 %v1350_v4  ;;  %1169 = vset.pattern.permute.xlu1 %v1351_v5  ;;  %p569_p4 = scmp.eq.s32.totalorder %s1327_s16, 1 }
  0x53   : > { %s459_s24 = scalar_lea.vmem %s1774_s0, %s1055_s27  ;;  %499 = vperm.xlu0 %1167, %v482_v2   ;;  %v546_v6 = vld [vmem:[%s1813_s13] sm:$0xff]  ;;  %vm568_vm4 = vcmp.ge.s32.totalorder %v558_v46, 144  ;;  %s1352_s25 = smov 32  }
  0x54   : > { %v468_v3 = vld [vmem:[%s459_s24] sm:$0xf]  ;;  %s562_s28 = scalar_select %p561_p1, 1, 0 }
  0x55   : > { %472 = vrot.lane.b32.xlu1 %v468_v3, %s1349_s30  ;;  %s570_s9 = scalar_select %p569_p4, 1, 0  ;;  %v583_v3 = vld [vmem:[#allocation5] sm:$0x3] }
  0x56   : > { %s467_s5 = scalar_lea.vmem %s1814_s1, %s1055_s27  ;;  %v563_v31 = vstv %s562_s28  ;;  %s1815_s23 = sld [smem:[#allocation18_spill]]  ;;  %vm584_vm8 = vcmp.ge.s32.totalorder %v583_v3, 1  ;;  %vm585_vm9 = vcmp.le.s32.totalorder %v583_v3, 14 }
  0x57   : > { %1170 = vset.pattern.permute.xlu0 %v1348_v1  ;;  %v469_v12 = vld [vmem:[%s467_s5] sm:$0xf]  ;;  %vm564_vm2 = vcmp.eq.s32.totalorder %v563_v31, 1  ;;  %v571_v48 = vstv %s570_s9  ;;  %s1354_s29 = smov 97   ;;  %s1355_s21 = smov 127  }
  0x58   : > { %549 = vperm.xlu0 %1170, %v546_v6   ;;  %vm565_vm3 = vmand %vm559_vm1, %vm564_vm2  ;;  %vm572_vm5 = vcmp.eq.s32.totalorder %v571_v48, 1  ;;  %s1360_s24 = smov 112   ;;  %s1816_s10 = sld [smem:[#allocation19_spill]] }
  0x59   : > { %531 = vperm.xlu1 %1169, %v482_v2   ;;  %vm574_vm6 = vmand %vm568_vm4, %vm572_vm5  ;;  %v1358_v2 = vmov 4   ;;  %s1817_s8 = sld [smem:[#allocation20_spill]]  ;;  %s896_s13 = scalar_lea.sflag [#allocation4], %s1542_s6 }
  0x5a   : > { %s1818_s28 = sld [smem:[#allocation21_spill]] }
  0x5b   : > { %s1819_s9 = sld [smem:[#allocation14_spill]] }
  0x5c   : > { %1172 = vset.pattern.permute.xlu0 %v1350_v4  ;;  %v1619_v53 = vld [vmem:[%s1815_s23] sm:$0xff]  ;;  %s451_s23 = scalar_lea.vmem [#allocation7], %s1051_s7  ;;  %s1820_s3 = sld [smem:[#allocation22_spill]] }
  0x5d   : > { %476 = vrot.lane.b32.xlu1 %v470_v7, %s1349_s30  ;;  %v593_v7 = vsel %vm584_vm8, 1, %v1348_v1 }
  0x5e   : > { %1171 = vset.pattern.permute.xlu1 %v1348_v1 }
  0x60   : > { %v876_v3 = vld [vmem:[%s1818_s28] sm:$0xf] }
  0x61   : > { %p1821_p0 = scmp.ne.s32.totalorder %s1819_s9, 0 }
  0xc9   : > { %v516_v10 = vpop.permute.xlu1 %515  ;;  %v486_v11 = vpop.permute.xlu0 %485 }
  0xcd   : > { %v1593_v16 = vpop.permute.xlu1 %472 }
  0xce   : > { %v480_v17 = vsel %vm479_vm0, %v469_v12, %v1593_v16  ;;  %v500_v18 = vpop.permute.xlu0 %499  ;;  %v616_v12 = vsel %vm585_vm9, 1, %v1348_v1 }
  0xcf   : > { %v491_v20 = vrot.slane %v480_v17, %v1585_v13  ;;  %v505_v21 = vrot.slane %v480_v17, %v1588_v14  ;;  %v521_v22 = vrot.slane %v480_v17, %v1591_v15  ;;  %v537_v26 = vrot.slane %v480_v17, %v1599_v19 }
  0xd1   : > { %v496_v23 = vmul.f32 %v491_v20, %v486_v11  ;;  %v510_v24 = vmul.f32 %v505_v21, %v500_v18  ;;  %v526_v28 = vmul.f32 %v521_v22, %v516_v10  ;;  %v624_v20 = vrot.slane %v616_v12, %v1588_v14 }
  0xd2   : > { %v620_v21 = vrot.slane %v616_v12, %v1585_v13 }
  0xd3   : > { %v512_v27 = vadd.f32 %v510_v24, %v496_v23  ;;  %v550_v39 = vpop.permute.xlu0 %549  ;;  %vm626_vm13 = vcmp.eq.s32.totalorder %v624_v20, 1 }
  0xd4   : > { %v532_v25 = vpop.permute.xlu1 %531  ;;  %vm625_vm15 = vcmp.eq.s32.totalorder %v620_v21, 1 }
  0xd5   : > { %v528_v32 = vadd.f32 %v526_v28, %v512_v27  ;;  %v542_v33 = vmul.f32 %v537_v26, %v532_v25 }
  0xd7   : > { %v544_v40 = vadd.f32 %v542_v33, %v528_v32 }
  0xd8   : > { %v477_v30 = vpop.permute.xlu1 %476 }
  0xd9   : > { %v481_v34 = vsel %vm479_vm0, %v1593_v16, %v477_v30  ;;  %v552_v45 = vadd.f32 %v550_v39, %v544_v40  ;;  %vm696_vm0 = vcmask 916480  }
  0xda   : > { %v495_v35 = vrot.slane %v481_v34, %v1585_v13  ;;  %v509_v36 = vrot.slane %v481_v34, %v1588_v14  ;;  %v525_v37 = vrot.slane %v481_v34, %v1591_v15  ;;  %v541_v38 = vrot.slane %v481_v34, %v1599_v19 }
  0xdb   : > { %v554_v49 = vmax.f32 %v552_v45, 0.0 }
  0xdc   : > { %v497_v41 = vmul.f32 %v495_v35, %v486_v11  ;;  %v511_v42 = vmul.f32 %v509_v36, %v500_v18  ;;  %v527_v43 = vmul.f32 %v525_v37, %v516_v10  ;;  %v543_v44 = vmul.f32 %v541_v38, %v532_v25 }
  0xdd   : > { %v1612_v51 = vsel %vm565_vm3, 0.0, %v554_v49  ;;  %v601_v10 = vrot.slane %v593_v7, %v1588_v14  ;;  %v597_v11 = vrot.slane %v593_v7, %v1585_v13 }
  0xde   : > { %v513_v47 = vadd.f32 %v511_v42, %v497_v41  ;;  %587 = vrot.lane.b32.xlu1 %v1612_v51, %s1352_s25 }
  0xdf   : > { %vm603_vm10 = vcmp.eq.s32.totalorder %v601_v10, 1  ;;  %vm602_vm12 = vcmp.eq.s32.totalorder %v597_v11, 1 }
  0xe0   : > { %v529_v50 = vadd.f32 %v527_v43, %v513_v47 }
  0xe2   : > { %v545_v52 = vadd.f32 %v543_v44, %v529_v50  ;;  %663 = vperm.xlu1 %1171, %v1619_v53   ;;  %v1359_v44 = vmov 5  }
  0xe4   : > { %v553_v54 = vadd.f32 %v550_v39, %v545_v52 }
  0xe6   : > { %v555_v55 = vmax.f32 %v553_v54, 0.0  ;;  %1173 = vset.pattern.permute.xlu1 %v1347_v0 }
  0xe7   : > { %677 = vperm.xlu1 %1173, %v1619_v53  }
  0xe8   : > { %v1622_v56 = vsel %vm574_vm6, 0.0, %v555_v55 }
  0xeb   : > { %1174 = vset.pattern.permute.xlu1 %v1353_v57 }
 0x150   : > { %v588_v58 = vpop.permute.xlu1 %587 }
 0x151   : > { %v589_v59 = vsel %vm586_vm7, %v588_v58, %v1622_v56 }
 0x152   : > { %606 = vrot.lane.b32.xlu1 %v589_v59, %s1354_s29  ;;  %590 = vrot.lane.b32.xlu0 %v589_v59, %s1352_s25 }
 0x156   : > { %628 = vrot.lane.b32.xlu1 %v1612_v51, %s1355_s21  ;;  %669 = vperm.xlu0 %1172, %v1619_v53  }
 0x15a   : > { %703 = vperm.xlu1 %1174, %v1619_v53   ;;  %1175 = vset.pattern.permute.xlu0 %v1356_v60 }
 0x15d   : > { %v664_v6 = vpop.permute.xlu1 %663 }
 0x15e   : > { %1176 = vset.pattern.permute.xlu1 %v1357_v61 }
 0x15f   : > { %717 = vperm.xlu1 %1176, %v1619_v53  }
 0x162   : > { %v678_v8 = vpop.permute.xlu1 %677 }
 0x163   : > { %1178 = vset.pattern.permute.xlu1 %v1358_v2 }
 0x1c4   : > { %v591_v62 = vpop.permute.xlu0 %590  ;;  %v607_v18 = vpop.permute.xlu1 %606 }
 0x1c5   : > { %v592_v63 = vsel %vm586_vm7, %v591_v62, %v588_v58  ;;  %v738_v58 = vld [vmem:[%s1816_s10] sm:$0xff] }
 0x1c6   : > { %608 = vrot.lane.b32.xlu0 %v592_v63, %s1354_s29  ;;  %s911_s29 = sshll.u32 %s451_s23, 4  ;;  %s912_s29 = int_to_ptr.vmem [resolvable:$true] %s911_s29 }
 0x1c7   : > { %s1243_s26 = scalar_lea.vmem %s912_s29, 64 }
 0x1c8   : > { %v629_v27 = vpop.permute.xlu1 %628  ;;  %p1244_p10 = scmp.ne.s32.totalorder %s912_s29, %s1243_s26 }
 0x1ca   : > { %630 = vrot.lane.b32.xlu0 %v589_v59, %s1355_s21  ;;  %p1245_p2 = pnand %p1244_p10, %p1821_p0 }
 0x1cc   : > { %p1246_p5 = pneg %p1245_p2 }
 0x1ce   : > { %709 = vperm.xlu0 %1175, %v1619_v53  }
 0x1d1   : > { %v670_v17 = vpop.permute.xlu0 %669 }
 0x1d2   : > { %1177 = vset.pattern.permute.xlu0 %v1351_v5  ;;  %v672_v29 = vmul.f32 %v670_v17, %v1612_v51  ;;  %v673_v46 = vmul.f32 %v670_v17, %v1622_v56 }
 0x1d5   : > { %v704_v36 = vpop.permute.xlu1 %703 }
 0x1da   : > { %v718_v37 = vpop.permute.xlu1 %717 }
 0x238   : > { %v609_v22 = vpop.permute.xlu0 %608 }
 0x239   : > { %v611_v23 = vsel %vm610_vm11, %v607_v18, %v609_v22  ;;  %v1645_v24 = vsel %vm603_vm10, %v609_v22, 0.0 }
 0x23a   : > { %v1647_v25 = vsel %vm602_vm12, %v611_v23, 0.0  ;;  %v667_v45 = vmul.f32 %v664_v6, %v1645_v24  ;;  %v707_v55 = vmul.f32 %v704_v36, %v1645_v24 }
 0x23b   : > { %v666_v26 = vmul.f32 %v664_v6, %v1647_v25  ;;  %v706_v39 = vmul.f32 %v704_v36, %v1647_v25 }
 0x23c   : > { %v631_v28 = vpop.permute.xlu0 %630  ;;  %v675_v48 = vadd.f32 %v673_v46, %v667_v45 }
 0x23d   : > { %v633_v30 = vsel %vm632_vm14, %v629_v27, %v631_v28  ;;  %v1651_v31 = vsel %vm626_vm13, %v631_v28, 0.0  ;;  %v674_v34 = vadd.f32 %v672_v29, %v666_v26 }
 0x23e   : > { %v1653_v32 = vsel %vm625_vm15, %v633_v30, 0.0  ;;  %v681_v47 = vmul.f32 %v678_v8, %v1651_v31  ;;  %v721_v59 = vmul.f32 %v718_v37, %v1651_v31 }
 0x23f   : > { %v680_v33 = vmul.f32 %v678_v8, %v1653_v32  ;;  %v720_v41 = vmul.f32 %v718_v37, %v1653_v32 }
 0x240   : > { %v683_v49 = vadd.f32 %v681_v47, %v675_v48 }
 0x241   : > { %v682_v35 = vadd.f32 %v680_v33, %v674_v34 }
 0x243   : > { %684 = vrot.lane.b32.xlu1 %v682_v35, %s1352_s25 }
 0x249   : > { %v710_v38 = vpop.permute.xlu0 %709 }
 0x24a   : > { %v712_v40 = vmul.f32 %v710_v38, %v1612_v51  ;;  %v713_v54 = vmul.f32 %v710_v38, %v1622_v56 }
 0x24c   : > { %v714_v42 = vadd.f32 %v712_v40, %v706_v39 }
 0x24e   : > { %v722_v43 = vadd.f32 %v720_v41, %v714_v42 }
 0x250   : > { %724 = vrot.lane.b32.xlu1 %v722_v43, %s1352_s25 }
 0x254   : > { %647 = vperm.xlu1 %1178, %v1619_v53  }
 0x258   : > { %1179 = vset.pattern.permute.xlu1 %v1359_v44 }
 0x259   : > { %655 = vperm.xlu1 %1179, %v1619_v53  }
 0x25d   : > { %729 = vrot.lane.b32.xlu1 %v722_v43, %s1360_s24 }
 0x25e   : > { %1181 = vset.pattern.permute.xlu1 %v1350_v4  ;;  %v715_v4 = vadd.f32 %v713_v54, %v707_v55  ;;  %v834_v55 = vsub.s32 5, %v1579_v9 }
 0x260   : > { %v723_v61 = vadd.f32 %v721_v59, %v715_v4 }
 0x2b5   : > { %v685_v50 = vpop.permute.xlu1 %684 }
 0x2b6   : > { %v686_v52 = vsel %vm586_vm7, %v685_v50, %v683_v49  ;;  %v818_v49 = vsub.s32 4, %v1579_v9 }
 0x2b7   : > { %687 = vrot.lane.b32.xlu0 %v686_v52, %s1352_s25  ;;  %s1059_s25 = sshll.u32 %s1331_s17, 1 }
 0x2b8   : > { %s907_s27 = sadd.s32 %s1327_s16, %s1059_s25  ;;  %s1361_s16 = smov [#allocation7]  }
 0x2b9   : > { %s1060_s11 = sshll.u32 %s907_s27, 6  ;;  %s1247_s17 = sshll.u32 %s1361_s16, 4  ;;  %s1248_s17 = int_to_ptr.vmem [resolvable:$false] %s1247_s17 }
 0x2ba   : > { %s1726_s10 = scalar_lea.hbm %s1820_s3, %s1060_s11  ;;  %s1249_s7 = scalar_lea.vmem %s1248_s17, 128 }
 0x2bb   : > { %641 = vperm.xlu0 %1177, %v1619_v53   ;;  %v748_v53 = vld [vmem:[%s1817_s8] sm:$0xf]  ;;  %p1250_p7 = scmp.lt.s32.totalorder %s912_s29, %s1248_s17  ;;  %p1251_p9 = scmp.lt.s32.totalorder %s1249_s7, %s1243_s26 }
 0x2bd   : > { %p1252_p6 = por %p1251_p9, %p1250_p7 }
 0x2bf   : > { %1180 = vset.pattern.permute.xlu0 %v1348_v1  ;;  %p1253_p11 = pnand %p1252_p6, %p1246_p5 }
 0x2c0   : > { %741 = vperm.xlu0 %1180, %v738_v58  }
 0x2c2   : > { %v725_v62 = vpop.permute.xlu1 %724 }
 0x2c3   : > { %v726_v63 = vsel %vm586_vm7, %v725_v62, %v723_v61 }
 0x2c4   : > { %692 = vrot.lane.b32.xlu0 %v686_v52, %s1360_s24  ;;  %731 = vrot.lane.b32.xlu1 %v726_v63, %s1360_s24 }
 0x2c8   : > { %751 = vperm.xlu0 %1180, %v748_v53  }
 0x2cc   : > { %1182 = vset.pattern.permute.xlu0 %v1347_v0 }
 0x2cd   : > { %781 = vperm.xlu0 %1182, %v748_v53  }
 0x2cf   : > { %v648_v0 = vpop.permute.xlu1 %647 }
 0x2d0   : > { %v650_v17 = vmul.f32 %v648_v0, %v1612_v51 }
 0x2d1   : > { %1185 = vset.pattern.permute.xlu0 %v1359_v44 }
 0x2d2   : > { %829 = vperm.xlu0 %1185, %v748_v53  }
 0x2d6   : > { %1188 = vset.pattern.permute.xlu0 %v1348_v1  ;;  %v656_v1 = vpop.permute.xlu1 %655 }
 0x2d7   : > { %879 = vperm.xlu0 %1188, %v876_v3   ;;  %v659_v21 = vmul.f32 %v656_v1, %v1651_v31 }
 0x2da   : > { %v730_v11 = vpop.permute.xlu1 %729 }
 0x329   : > { %v688_v6 = vpop.permute.xlu0 %687 }
 0x32a   : > { %v689_v7 = vsel %vm586_vm7, %v688_v6, %v685_v50  ;;  %v850_v6 = vsub.s32 6, %v1579_v9 }
 0x32b   : > { %694 = vrot.lane.b32.xlu1 %v689_v7, %s1360_s24 }
 0x32f   : > { %765 = vperm.xlu1 %1181, %v748_v53  }
 0x333   : > { %1183 = vset.pattern.permute.xlu1 %v1351_v5  ;;  %v651_v5 = vmul.f32 %v648_v0, %v1622_v56 }
 0x334   : > { %797 = vperm.xlu1 %1183, %v748_v53  }
 0x336   : > { %v642_v8 = vpop.permute.xlu0 %641 }
 0x337   : > { %v645_v10 = vmul.f32 %v642_v8, %v1645_v24  ;;  %v644_v12 = vmul.f32 %v642_v8, %v1647_v25 }
 0x338   : > { %1184 = vset.pattern.permute.xlu1 %v1358_v2 }
 0x339   : > { %813 = vperm.xlu1 %1184, %v748_v53   ;;  %v653_v18 = vadd.f32 %v651_v5, %v645_v10  ;;  %v652_v20 = vadd.f32 %v650_v17, %v644_v12  ;;  %v866_v12 = vsub.s32 7, %v1579_v9 }
 0x33b   : > { %v742_v2 = vpop.permute.xlu0 %741  ;;  %v661_v22 = vadd.f32 %v659_v21, %v653_v18 }
 0x33d   : > { %1186 = vset.pattern.permute.xlu1 %v1353_v57  ;;  %v732_v57 = vpop.permute.xlu1 %731 }
 0x33e   : > { %845 = vperm.xlu1 %1186, %v748_v53   ;;  %v733_v56 = vsel %vm696_vm0, %v730_v11, %v732_v57 }
 0x33f   : > { %v693_v23 = vpop.permute.xlu0 %692 }
 0x342   : > { %1187 = vset.pattern.permute.xlu1 %v1356_v60  ;;  %v658_v60 = vmul.f32 %v656_v1, %v1653_v32 }
 0x343   : > { %861 = vperm.xlu1 %1187, %v748_v53   ;;  %v752_v36 = vpop.permute.xlu0 %751 }
 0x344   : > { %v660_v26 = vadd.f32 %v658_v60, %v652_v20 }
 0x348   : > { %v782_v48 = vpop.permute.xlu0 %781 }
 0x34d   : > { %v830_v10 = vpop.permute.xlu0 %829 }
 0x352   : > { %v880_v9 = vpop.permute.xlu0 %879 }
 0x39d   : > { %v695_v24 = vpop.permute.xlu1 %694 }
 0x39e   : > { %v697_v27 = vsel %vm696_vm0, %v693_v23, %v695_v24  ;;  %v701_v25 = vadd.f32 %v695_v24, %v661_v22 }
 0x39f   : > { %v700_v28 = vadd.f32 %v697_v27, %v660_v26 }
 0x3a0   : > { %v737_v51 = vadd.f32 %v732_v57, %v701_v25 }
 0x3a1   : > { %v736_v29 = vadd.f32 %v733_v56, %v700_v28 }
 0x3a2   : > { %v745_v30 = vadd.f32 %v742_v2, %v737_v51 }
 0x3a3   : > { %v744_v33 = vadd.f32 %v742_v2, %v736_v29 }
 0x3a4   : > { %v747_v34 = vmax.f32 %v745_v30, 0.0 }
 0x3a5   : > { %v746_v35 = vmax.f32 %v744_v33, 0.0 }
 0x3a6   : > { %v761_v32 = vrot.slane %v747_v34, %v1585_v13  ;;  %v775_v38 = vrot.slane %v747_v34, %v1588_v14  ;;  %v791_v40 = vrot.slane %v747_v34, %v1591_v15  ;;  %v823_v62 = vrot.slane %v747_v34, %v818_v49 }
 0x3a7   : > { %v757_v31 = vrot.slane %v746_v35, %v1585_v13  ;;  %v771_v37 = vrot.slane %v746_v35, %v1588_v14  ;;  %v787_v39 = vrot.slane %v746_v35, %v1591_v15  ;;  %v803_v52 = vrot.slane %v746_v35, %v1599_v19 }
 0x3a8   : > { %v763_v43 = vmul.f32 %v761_v32, %v752_v36  ;;  %v793_v50 = vmul.f32 %v791_v40, %v782_v48  ;;  %v807_v14 = vrot.slane %v747_v34, %v1599_v19  ;;  %v819_v61 = vrot.slane %v746_v35, %v818_v49 }
 0x3a9   : > { %v762_v42 = vmul.f32 %v757_v31, %v752_v36  ;;  %v792_v13 = vmul.f32 %v787_v39, %v782_v48  ;;  %v835_v63 = vrot.slane %v746_v35, %v834_v55  ;;  %v839_v53 = vrot.slane %v747_v34, %v834_v55 }
 0x3aa   : > { %v766_v41 = vpop.permute.xlu1 %765  ;;  %v851_v2 = vrot.slane %v746_v35, %v850_v6  ;;  %v855_v18 = vrot.slane %v747_v34, %v850_v6  ;;  %v867_v23 = vrot.slane %v746_v35, %v866_v12  ;;  %v871_v26 = vrot.slane %v747_v34, %v866_v12 }
 0x3ab   : > { %v776_v44 = vmul.f32 %v771_v37, %v766_v41  ;;  %v777_v45 = vmul.f32 %v775_v38, %v766_v41  ;;  %v840_v5 = vmul.f32 %v835_v63, %v830_v10  ;;  %v841_v17 = vmul.f32 %v839_v53, %v830_v10 }
 0x3ad   : > { %v778_v46 = vadd.f32 %v776_v44, %v762_v42  ;;  %v779_v47 = vadd.f32 %v777_v45, %v763_v43 }
 0x3af   : > { %v798_v54 = vpop.permute.xlu1 %797  ;;  %v794_v15 = vadd.f32 %v792_v13, %v778_v46  ;;  %v795_v4 = vadd.f32 %v793_v50, %v779_v47 }
 0x3b0   : > { %v808_v58 = vmul.f32 %v803_v52, %v798_v54  ;;  %v809_v59 = vmul.f32 %v807_v14, %v798_v54 }
 0x3b2   : > { %v810_v7 = vadd.f32 %v808_v58, %v794_v15  ;;  %v811_v0 = vadd.f32 %v809_v59, %v795_v4 }
 0x3b4   : > { %v814_v3 = vpop.permute.xlu1 %813 }
 0x3b5   : > { %v824_v1 = vmul.f32 %v819_v61, %v814_v3  ;;  %v825_v8 = vmul.f32 %v823_v62, %v814_v3 }
 0x3b7   : > { %v826_v19 = vadd.f32 %v824_v1, %v810_v7  ;;  %v827_v11 = vadd.f32 %v825_v8, %v811_v0 }
 0x3b9   : > { %v846_v20 = vpop.permute.xlu1 %845  ;;  %v842_v57 = vadd.f32 %v840_v5, %v826_v19  ;;  %v843_v21 = vadd.f32 %v841_v17, %v827_v11 }
 0x3ba   : > { %v856_v60 = vmul.f32 %v851_v2, %v846_v20  ;;  %v857_v22 = vmul.f32 %v855_v18, %v846_v20 }
 0x3bc   : > { %v858_v27 = vadd.f32 %v856_v60, %v842_v57  ;;  %v859_v25 = vadd.f32 %v857_v22, %v843_v21 }
 0x3be   : > { %v862_v24 = vpop.permute.xlu1 %861 }
 0x3bf   : > { %v872_v28 = vmul.f32 %v867_v23, %v862_v24  ;;  %v873_v56 = vmul.f32 %v871_v26, %v862_v24 }
 0x3c1   : > { %v874_v51 = vadd.f32 %v872_v28, %v858_v27  ;;  %v875_v29 = vadd.f32 %v873_v56, %v859_v25 }
 0x3c3   : > { %v882_v30 = vadd.f32 %v880_v9, %v874_v51  ;;  %v883_v33 = vadd.f32 %v880_v9, %v875_v29 }
 0x3c5   : > { %v884_v31 = vadd.f32 %v882_v30, %v1593_v16  ;;  %v885_v35 = vadd.f32 %v883_v33, %v1593_v16 }
 0x3c7   : > { %888 = vrot.lane.b32.xlu1 %v884_v31, %s1360_s24 }
 0x3cb   : > { %890 = vrot.lane.b32.xlu1 %v885_v35, %s1360_s24 }
 0x439   : > { %v889_v34 = vpop.permute.xlu1 %888 }
 0x43d   : > { %v891_v32 = vpop.permute.xlu1 %890 }
 0x43e   : > { %v892_v36 = vsel %vm696_vm0, %v889_v34, %v891_v32 }
 0x43f   : > { %894 = vst [vmem:[%s451_s23] sm:$0xf] %v892_v36 }
 0x440   : > { %1256 = shalt.err (!%p1253_p11)
}
 0x441   : > { %s1257_s24 = scalar_lea.hbm %s1726_s10, 64  ;;  %s1261_s1 = scalar_lea.hbm %s1820_s3, 256 }
 0x442   : > { %p1258_p12 = scmp.ne.s32.totalorder %s1726_s10, %s1257_s24  ;;  %p1262_p13 = scmp.lt.s32.totalorder %s1726_s10, %s1820_s3 }
 0x443   : > { %p1263_p1 = scmp.lt.s32.totalorder %s1261_s1, %s1257_s24 }
 0x444   : > { %p1259_p3 = pnand %p1258_p12, %p1821_p0 }
 0x445   : > { %p1264_p4 = por %p1263_p1, %p1262_p13 }
 0x446   : > { %p1260_p8 = pneg %p1259_p3 }
 0x448   : > { %p1265_p10 = pnand %p1264_p4, %p1260_p8 }
 0x44a   : > { %1268 = shalt.err (!%p1265_p10)
}
 0x44b   : > { %1069 = dma.vmem_to_hbm [thread:$0]  (%p1821_p0), %s912_s29, 64, %s1726_s10, %s896_s13  }
 0x44c PF: > { %s1822_s25 = sld [smem:[#allocation11_spill]]  ;;  %p1086_p2 = scmp.ge.s32.totalorder %s1343_s20, 2 }
 0x44d   : > { %s1823_s27 = sld [smem:[#allocation12_spill]] }
 0x452   : > { %s923_s11 = sand.u32 1, %s1822_s25  }
 0x453   : > { %p1824_p5 = scmp.ne.s32.totalorder %s1823_s27, 0  ;;  %s924_s23 = scalar_lea.sflag [#allocation4], %s923_s11 }
 0x455   : > { %p1080_p7 = pnand %p1086_p2, %p1824_p5 }
 0x457   : > { %p1081_p9 = pneg %p1080_p7 }
 0x459   : > { %1310 = dma.done.wait (%p1081_p9), %s924_s23, 64  }
 0x45a   : > { %1312 = vsyncadd (%p1081_p9), %s924_s23, 4294967232  ;;  %s27_s20 = sadd.s32 1, %s1343_s20   ;;  %s1825_s9 = sld [smem:[#allocation13_spill]] }
 0x45b   : > { %p24_p6 = scmp.ge.s32.totalorder %s27_s20, 6   ;;  %s1826_s13 = smov %s1319_s14 }
 0x45c   : > { %s1827_s14 = smov %s1323_s15  ;;  %s1828_s15 = smov %s1522_s12 }
 0x45d   : > { %s1829_s16 = smov %s1335_s18  ;;  %s1830_s17 = smov %s1339_s19 }
 0x45e   : > { %s1832_s19 = smov %s1838_s22  ;;  %26 = sbr.rel (!%p24_p6) target bundleno = 17 (0x11), region = 115 }
 0x460   : > { %s1831_s18 = smov %s1825_s9 }
 0x463   :  { %929 = vsyncpa [#allocation3], 1 }
 0x464   :  { %931 = vsyncpa [#allocation3 + $0x1], 1 }
 0x465   :  { %932 = vsyncpa [#allocation6], 1 }
 0x466   :  { %933 = vsyncpa [#allocation4], 1 }
 0x467   :  { %935 = vsyncpa [#allocation4 + $0x1], 1 }

</bundles_post_ra>
